<compile_context>
chip_gen: v6e
topology: v6e:2x2x1
jax: 0.10.0
libtpu: 0.0.40
codegen_flags: <defaults>
</compile_context>

<pallas_src>
from functools import partial

import jax
import jax.numpy as jnp
from jax.experimental import pallas as pl
from jax.experimental.pallas import tpu as pltpu


PAD = 128       # lane width of the hidden layers / packed weights
TB_MAX = 4096   # max batch-tile rows per grid step (keeps 2x-buffered tiles ~8 MiB)


def _cdiv(a, b):
    return -(-a // b)


def _round_up(n, m):
    return _cdiv(n, m) * m


def _sublane_align(dtype):
    # rows per native sublane tile: f32 -> 8, bf16 -> 16, int8/fp8 -> 32
    return {4: 8, 2: 16, 1: 32}[jnp.dtype(dtype).itemsize]


def _qnet_kernel(x_ref, w_ref, b_ref, out_ref):
    """Fused 3-layer MLP on one (TB, S_pad) batch tile.

    x_ref  : (TB, S_pad)    activations (f32 or bf16); S_pad = padded state dim
    w_ref  : (3, PAD, PAD)  packed weights, (in, out) layout (same dtype as x)
    b_ref  : (8, PAD) f32   rows 0..2 hold b1/b2/b3
    out_ref: (TB, A) f32    A = action_size (narrow lane-masked store)
    """
    s_in = x_ref.shape[1]        # static (padded state dim)
    a_out = out_ref.shape[1]     # static (action dim)
    wdt = w_ref.dtype
    b = b_ref[...]               # (8, PAD) f32, resident

    x = x_ref[...]                                   # (TB, s_in) -- no 128-lane pad
    w1 = w_ref[0, :s_in, :]                          # static sublane-aligned slice
    h = jnp.dot(x, w1, preferred_element_type=jnp.float32) + b[0:1, :]
    h = jnp.maximum(h, 0.0)
    h = jnp.dot(h.astype(wdt), w_ref[1], preferred_element_type=jnp.float32) + b[1:2, :]
    h = jnp.maximum(h, 0.0)
    h = jnp.dot(h.astype(wdt), w_ref[2], preferred_element_type=jnp.float32) + b[2:3, :]
    h = jnp.maximum(h, 0.0)
    out_ref[...] = h[:, :a_out].astype(out_ref.dtype)   # store only live lanes


def prepare_params(params, dtype=jnp.bfloat16):
    """One-time padding + packing (hoisted out of the per-call hot path).

    params: dict with w1/w2/w3 stored (in, out) and b1/b2/b3 as (out,).
    Returns (w_packed (3, PAD, PAD) in `dtype`, b_packed (8, PAD) f32).
    Zero padding is exact: padded rows/columns contribute 0 and relu(0)=0.
    """
    def pad2(a):
        r, c = a.shape
        return jnp.pad(a.astype(dtype), ((0, PAD - r), (0, PAD - c)))

    w_packed = jnp.stack([pad2(params[f"w{i}"]) for i in (1, 2, 3)], axis=0)
    b_packed = jnp.zeros((8, PAD), jnp.float32)
    for i in (1, 2, 3):
        bi = params[f"b{i}"].astype(jnp.float32)
        b_packed = b_packed.at[i - 1, : bi.shape[0]].set(bi)
    return w_packed, b_packed


@partial(jax.jit, static_argnames=("action_size",))
def qnetwork_forward(state, w_packed, b_packed, *, action_size):
    """state: (B, state_size). Returns (B, action_size) f32."""
    B, S = state.shape
    assert S <= PAD and action_size <= PAD

    compute_dtype = w_packed.dtype
    align = _sublane_align(compute_dtype)

    # Grid / tile selection:
    #   * at most TB_MAX rows per step,
    #   * >= 2 steps when there is enough work (v7x megacore uses both TCs),
    #   * row-padding waste < `align` rows per tile.
    n_steps = max(_cdiv(B, TB_MAX), 2 if B >= 2 * align else 1)
    TB = _round_up(_cdiv(B, n_steps), align)
    BP = n_steps * TB
    S_pad = _round_up(S, align)          # tiny lane pad; keeps the w1 slice tile-aligned

    x_p = jnp.pad(state.astype(compute_dtype), ((0, BP - B), (0, S_pad - S)))

    out_p = pl.pallas_call(
        _qnet_kernel,
        out_shape=jax.ShapeDtypeStruct((BP, action_size), jnp.float32),
        grid_spec=pltpu.PrefetchScalarGridSpec(
            num_scalar_prefetch=0,
            grid=(n_steps,),
            in_specs=[
                pl.BlockSpec((TB, S_pad), lambda i: (i, 0)),        # x batch tile
                pl.BlockSpec((3, PAD, PAD), lambda i: (0, 0, 0)),   # weights, resident
                pl.BlockSpec((8, PAD), lambda i: (0, 0)),           # biases, resident
            ],
            out_specs=pl.BlockSpec((TB, action_size), lambda i: (i, 0)),  # narrow out
        ),
        compiler_params=pltpu.CompilerParams(
            dimension_semantics=("parallel",),
            vmem_limit_bytes=32 * 1024 * 1024,   # safe on v5e/v6e/v7x; headroom if TB grows
        ),
    )(x_p, w_packed, b_packed)

    return out_p[:B, :]   # trim padded rows only (columns are already exact)


def init_params(key, state_size, action_size):
    """Deterministic init mimicking PyTorch Linear's U(-1/sqrt(fan_in), +1/sqrt(fan_in)).
    Weights are stored (in, out)."""
    dims = [(state_size, 6), (6, 6), (6, action_size)]
    params = {}
    for i, (fan_in, fan_out) in enumerate(dims, start=1):
        key, kw, kb = jax.random.split(key, 3)
        bound = 1.0 / (fan_in ** 0.5)
        params[f"w{i}"] = jax.random.uniform(
            kw, (fan_in, fan_out), jnp.float32, -bound, bound)
        params[f"b{i}"] = jax.random.uniform(
            kb, (fan_out,), jnp.float32, -bound, bound)
    return params


def _reference_forward(state, params):
    h = jnp.maximum(state @ params["w1"] + params["b1"], 0.0)
    h = jnp.maximum(h @ params["w2"] + params["b2"], 0.0)
    # Final ReLU matches the reference PyTorch module (F.relu after fc3).
    return jnp.maximum(h @ params["w3"] + params["b3"], 0.0)


if __name__ == "__main__":
    state_size, action_size, batch = 8, 4, 2

    key = jax.random.PRNGKey(0)
    key, kx = jax.random.split(key)
    params = init_params(key, state_size, action_size)
    state = jax.random.normal(kx, (batch, state_size), jnp.float32)

    # Exact f32 path (single-step grid).
    w_f32, b_f32 = prepare_params(params, dtype=jnp.float32)
    out = jax.block_until_ready(
        qnetwork_forward(state, w_f32, b_f32, action_size=action_size))
    ref = _reference_forward(state, params)
    assert out.shape == (batch, action_size), out.shape
    assert jnp.allclose(out, ref, atol=1e-5, rtol=1e-5), (out, ref)

    # Default bf16 compute path (MXU-native; f32 accumulate + epilogue), 2-step grid.
    key, kb = jax.random.split(key)
    big_state = jax.random.normal(kb, (64, state_size), jnp.float32)
    w_bf16, b_bf16 = prepare_params(params)          # bf16 by default
    out_bf16 = jax.block_until_ready(
        qnetwork_forward(big_state, w_bf16, b_bf16, action_size=action_size))
    ref_big = _reference_forward(big_state, params)
    assert out_bf16.shape == (64, action_size), out_bf16.shape
    assert jnp.allclose(out_bf16, ref_big, atol=5e-2, rtol=5e-2)

    print("KERNEL_OK")
</pallas_src>

<mosaic_0001>
module attributes {stable_mosaic.version = 11 : i64} {
  func.func @_qnet_kernel(%arg0: i32, %arg1: memref<8x8xf32, #tpu.memory_space<vmem>>, %arg2: memref<3x128x128xf32, #tpu.memory_space<vmem>>, %arg3: memref<8x128xf32, #tpu.memory_space<vmem>>, %arg4: memref<8x4xf32, #tpu.memory_space<vmem>>) attributes {dimension_semantics = [#tpu.dimension_semantics<parallel>], iteration_bounds = array<i64: 1>, scalar_prefetch = 0 : i64, scratch_operands = 0 : i64, tpu.core_type = #tpu.core_type<tc>, window_params = [{transform_indices = @transform_0, window_bounds = array<i64: 8, 8>}, {pipeline_mode = #tpu.pipeline_mode<synchronous>, transform_indices = @transform_1, window_bounds = array<i64: 3, 128, 128>}, {pipeline_mode = #tpu.pipeline_mode<synchronous>, transform_indices = @transform_2, window_bounds = array<i64: 8, 128>}, {transform_indices = @transform_3, window_bounds = array<i64: 8, 4>}]} {
    %c0 = arith.constant 0 : index
    %c0_0 = arith.constant 0 : index
    %0 = vector.load %arg3[%c0, %c0_0] : memref<8x128xf32, #tpu.memory_space<vmem>>, vector<8x128xf32>
    %c0_1 = arith.constant 0 : index
    %c0_2 = arith.constant 0 : index
    %1 = vector.load %arg1[%c0_1, %c0_2] : memref<8x8xf32, #tpu.memory_space<vmem>>, vector<8x8xf32>
    %c0_3 = arith.constant 0 : index
    %c0_4 = arith.constant 0 : index
    %c0_5 = arith.constant 0 : index
    %2 = vector.load %arg2[%c0_3, %c0_4, %c0_5] : memref<3x128x128xf32, #tpu.memory_space<vmem>>, vector<1x8x128xf32>
    %3 = vector.shape_cast %2 : vector<1x8x128xf32> to vector<8x128xf32>
    %cst = arith.constant dense<0.000000e+00> : vector<8x128xf32>
    %4 = tpu.matmul %1, %3, %cst {dimension_numbers = #tpu.dot_dimension_numbers<[1], [0], [0], [1], [0, 0, 1, 1], [], []>} : vector<8x8xf32>, vector<8x128xf32>, vector<8x128xf32> -> vector<8x128xf32>
    %5 = vector.extract_strided_slice %0 {offsets = [0, 0], sizes = [1, 128], strides = [1, 1]} : vector<8x128xf32> to vector<1x128xf32>
    %6 = vector.broadcast %5 : vector<1x128xf32> to vector<8x128xf32>
    %7 = arith.addf %4, %6 : vector<8x128xf32>
    %cst_6 = arith.constant 0.000000e+00 : f32
    %8 = vector.broadcast %cst_6 : f32 to vector<8x128xf32>
    %9 = arith.maximumf %7, %8 : vector<8x128xf32>
    %c1 = arith.constant 1 : index
    %c0_7 = arith.constant 0 : index
    %c0_8 = arith.constant 0 : index
    %10 = vector.load %arg2[%c1, %c0_7, %c0_8] : memref<3x128x128xf32, #tpu.memory_space<vmem>>, vector<1x128x128xf32>
    %11 = vector.shape_cast %10 : vector<1x128x128xf32> to vector<128x128xf32>
    %cst_9 = arith.constant dense<0.000000e+00> : vector<8x128xf32>
    %12 = tpu.matmul %9, %11, %cst_9 {dimension_numbers = #tpu.dot_dimension_numbers<[1], [0], [0], [1], [0, 0, 1, 1], [], []>} : vector<8x128xf32>, vector<128x128xf32>, vector<8x128xf32> -> vector<8x128xf32>
    %13 = vector.extract_strided_slice %0 {offsets = [1, 0], sizes = [1, 128], strides = [1, 1]} : vector<8x128xf32> to vector<1x128xf32>
    %14 = vector.broadcast %13 : vector<1x128xf32> to vector<8x128xf32>
    %15 = arith.addf %12, %14 : vector<8x128xf32>
    %cst_10 = arith.constant 0.000000e+00 : f32
    %16 = vector.broadcast %cst_10 : f32 to vector<8x128xf32>
    %17 = arith.maximumf %15, %16 : vector<8x128xf32>
    %c2 = arith.constant 2 : index
    %c0_11 = arith.constant 0 : index
    %c0_12 = arith.constant 0 : index
    %18 = vector.load %arg2[%c2, %c0_11, %c0_12] : memref<3x128x128xf32, #tpu.memory_space<vmem>>, vector<1x128x128xf32>
    %19 = vector.shape_cast %18 : vector<1x128x128xf32> to vector<128x128xf32>
    %cst_13 = arith.constant dense<0.000000e+00> : vector<8x128xf32>
    %20 = tpu.matmul %17, %19, %cst_13 {dimension_numbers = #tpu.dot_dimension_numbers<[1], [0], [0], [1], [0, 0, 1, 1], [], []>} : vector<8x128xf32>, vector<128x128xf32>, vector<8x128xf32> -> vector<8x128xf32>
    %21 = vector.extract_strided_slice %0 {offsets = [2, 0], sizes = [1, 128], strides = [1, 1]} : vector<8x128xf32> to vector<1x128xf32>
    %22 = vector.broadcast %21 : vector<1x128xf32> to vector<8x128xf32>
    %23 = arith.addf %20, %22 : vector<8x128xf32>
    %cst_14 = arith.constant 0.000000e+00 : f32
    %24 = vector.broadcast %cst_14 : f32 to vector<8x128xf32>
    %25 = arith.maximumf %23, %24 : vector<8x128xf32>
    %26 = vector.extract_strided_slice %25 {offsets = [0, 0], sizes = [8, 4], strides = [1, 1]} : vector<8x128xf32> to vector<8x4xf32>
    %c0_15 = arith.constant 0 : index
    %c0_16 = arith.constant 0 : index
    %27 = vector.load %arg4[%c0_15, %c0_16] : memref<8x4xf32, #tpu.memory_space<vmem>>, vector<8x4xf32>
    tpu.vector_store %arg4[%c0_15, %c0_16], %26 {strides = array<i32>} : memref<8x4xf32, #tpu.memory_space<vmem>>, vector<8x4xf32>,
    return
  }
  func.func @transform_0(%arg0: i32) -> (i32, i32) {
    %c0_i32 = arith.constant 0 : i32
    %c0_i32_0 = arith.constant 0 : i32
    return %arg0, %c0_i32 : i32, i32
  }
  func.func @transform_1(%arg0: i32) -> (i32, i32, i32) {
    %c0_i32 = arith.constant 0 : i32
    %c0_i32_0 = arith.constant 0 : i32
    %c0_i32_1 = arith.constant 0 : i32
    %c0_i32_2 = arith.constant 0 : i32
    return %c0_i32, %c0_i32_0, %c0_i32_1 : i32, i32, i32
  }
  func.func @transform_2(%arg0: i32) -> (i32, i32) {
    %c0_i32 = arith.constant 0 : i32
    %c0_i32_0 = arith.constant 0 : i32
    %c0_i32_1 = arith.constant 0 : i32
    return %c0_i32, %c0_i32_0 : i32, i32
  }
  func.func @transform_3(%arg0: i32) -> (i32, i32) {
    %c0_i32 = arith.constant 0 : i32
    %c0_i32_0 = arith.constant 0 : i32
    return %arg0, %c0_i32 : i32, i32
  }
}

</mosaic_0001>

<bundles_post_ra>
// kernel: qnetwork_forward.1
= control target key start
LH: loop header
LB: loop body
LE: loop exit
PB: predicated region body
PF: predicated region fallthrough
CT: control target
= control target key end

     0   :  { %8 = vsyncpa [#allocation3], 0  ;;  %s440_s12 = smov [#allocation2]   ;;  %s516_s0 = inlined_call_operand.vmem [shape: f32[8,8], index: 0, kind: input, shape index: {}]   ;;  %s517_s1 = inlined_call_operand.hbm [shape: f32[3,128,128], index: 1, kind: input, shape index: {}]   ;;  %s518_s2 = inlined_call_operand.vmem [shape: f32[8,128], index: 2, kind: input, shape index: {}]   ;;  %s519_s3 = inlined_call_operand.vmem [shape: f32[8,4], index: 3, kind: output, shape index: {}]  }
   0x1   :  { %s16_s13 = sshll.u32 %s440_s12, 4  ;;  %s17_s13 = int_to_ptr.vmem [resolvable:$true] %s16_s13 }
   0x2   :  { %s426_s14 = scalar_lea.vmem %s17_s13, 6144  ;;  %p431_p1 = scmp.lt.s32.totalorder %s17_s13, %s17_s13 }
   0x3   :  { %p427_p0 = scmp.ne.s32.totalorder %s17_s13, %s426_s14  ;;  %p432_p2 = scmp.lt.s32.totalorder %s426_s14, %s426_s14 }
   0x5   :  { %p433_p3 = por %p432_p2, %p431_p1 }
   0x7   :  { %p434_p4 = pnand %p433_p3, %p427_p0 }
   0x9   :  { %437 = shalt.err (!%p434_p4)
}
   0xa   :  { %s441_s15 = smov 128   ;;  %s442_s16 = smov 8  }
   0xb   :  { %22 = dma.hbm_to_vmem [thread:$0]  %s517_s1, 6144, %s17_s13, [#allocation3], %s441_s15, %s441_s15, %s442_s16  }
   0xc   :  { %438 = dma.done.wait [#allocation3], 6144  }
   0xd   :  { %439 = vsyncadd [#allocation3], 4294961152  ;;  %v443_v0 = vmov 0.0   ;;  %vm444_vm0 = vmmov 0   ;;  %vm35_vm1 = vcmask 64512   ;;  %v30_v1 = vld [vmem:[#allocation2] sm:$0xff]  ;;  %v31_v32 = vlaneseq }
   0xe   :  { %338 = vmatprep.subr.mxu0 %v443_v0  ;;  %340 = vmatprep.mubr.msk.f32.mxu0 %vm444_vm0, %v443_v0  ;;  %v29_v2 = vld [vmem:[%s516_s0] sm:$0xff]  ;;  %v126_v3 = vld [vmem:[#allocation2 + $0xf8] sm:$0xff]  ;;  %v125_v4 = vld [vmem:[#allocation2 + $0xf0] sm:$0xff]  ;;  %vm294_vm2 = vcmask 31744  }
   0xf   :  { %343 = vmatprep.subr.mxu1 %v443_v0  ;;  %375 = vmatprep.mubr.msk.f32.mxu1 %vm444_vm0, %v443_v0  ;;  %v124_v5 = vld [vmem:[#allocation2 + $0xe8] sm:$0xff]  ;;  %v123_v6 = vld [vmem:[#allocation2 + $0xe0] sm:$0xff]  ;;  %v122_v7 = vld [vmem:[#allocation2 + $0xd8] sm:$0xff]  ;;  %v32_v33 = vshrl.u32 %v31_v32, 7 }
  0x10   :  { %339 = vmatpush3.msra.mxu0 %v30_v1  ;;  %344 = vmatpush3.msra.mxu1 %v126_v3  ;;  %v121_v8 = vld [vmem:[#allocation2 + $0xd0] sm:$0xff]  ;;  %v120_v9 = vld [vmem:[#allocation2 + $0xc8] sm:$0xff]  ;;  %v119_v10 = vld [vmem:[#allocation2 + $0xc0] sm:$0xff] }
  0x11   :  { %341 = vmatmul.mubr.msk.f32.vlgmr.msra.gmra.mxu0 %vm35_vm1, %v29_v2  ;;  %345 = vmatprep.subr.mxu1 %v443_v0  ;;  %v118_v11 = vld [vmem:[#allocation2 + $0xb8] sm:$0xff]  ;;  %v117_v12 = vld [vmem:[#allocation2 + $0xb0] sm:$0xff]  ;;  %v116_v13 = vld [vmem:[#allocation2 + $0xa8] sm:$0xff]  ;;  %v33_v34 = vsub.s32 0, %v32_v33  ;;  %v129_v44 = vsub.s32 1, %v32_v33  ;;  %v221_v50 = vsub.s32 2, %v32_v33 }
  0x12   :  { %346 = vmatpush3.msra.mxu1 %v125_v4  ;;  %378 = vmatprep.subr.mxu0 %v443_v0  ;;  %v115_v14 = vld [vmem:[#allocation2 + $0xa0] sm:$0xff]  ;;  %v114_v15 = vld [vmem:[#allocation2 + $0x98] sm:$0xff]  ;;  %v113_v16 = vld [vmem:[#allocation2 + $0x90] sm:$0xff] }
  0x13   :  { %347 = vmatprep.subr.mxu1 %v443_v0  ;;  %410 = vmatprep.mubr.msk.f32.mxu0 %vm444_vm0, %v443_v0  ;;  %v112_v17 = vld [vmem:[#allocation2 + $0x88] sm:$0xff]  ;;  %v111_v18 = vld [vmem:[#allocation2 + $0x80] sm:$0xff]  ;;  %v218_v19 = vld [vmem:[#allocation2 + $0x178] sm:$0xff] }
  0x14   :  { %348 = vmatpush3.msra.mxu1 %v124_v5  ;;  %v217_v20 = vld [vmem:[#allocation2 + $0x170] sm:$0xff]  ;;  %379 = vmatpush3.msra.mxu0 %v218_v19  ;;  %v216_v21 = vld [vmem:[#allocation2 + $0x168] sm:$0xff]  ;;  %v215_v22 = vld [vmem:[#allocation2 + $0x160] sm:$0xff] }
  0x15   :  { %349 = vmatprep.subr.mxu1 %v443_v0  ;;  %380 = vmatprep.subr.mxu0 %v443_v0  ;;  %v214_v23 = vld [vmem:[#allocation2 + $0x158] sm:$0xff]  ;;  %v213_v24 = vld [vmem:[#allocation2 + $0x150] sm:$0xff]  ;;  %v212_v25 = vld [vmem:[#allocation2 + $0x148] sm:$0xff] }
  0x16   :  { %350 = vmatpush3.msra.mxu1 %v123_v6  ;;  %381 = vmatpush3.msra.mxu0 %v217_v20  ;;  %v211_v26 = vld [vmem:[#allocation2 + $0x140] sm:$0xff]  ;;  %v210_v27 = vld [vmem:[#allocation2 + $0x138] sm:$0xff]  ;;  %v209_v28 = vld [vmem:[#allocation2 + $0x130] sm:$0xff] }
  0x17   :  { %351 = vmatprep.subr.mxu1 %v443_v0  ;;  %382 = vmatprep.subr.mxu0 %v443_v0  ;;  %v208_v29 = vld [vmem:[#allocation2 + $0x128] sm:$0xff]  ;;  %v207_v30 = vld [vmem:[#allocation2 + $0x120] sm:$0xff]  ;;  %v206_v31 = vld [vmem:[#allocation2 + $0x118] sm:$0xff] }
  0x18   :  { %352 = vmatpush3.msra.mxu1 %v122_v7  ;;  %383 = vmatpush3.msra.mxu0 %v216_v21  ;;  %v28_v35 = vld [vmem:[%s518_s2] sm:$0xff]  ;;  %v205_v41 = vld [vmem:[#allocation2 + $0x110] sm:$0xff]  ;;  %v204_v42 = vld [vmem:[#allocation2 + $0x108] sm:$0xff] }
  0x19   :  { %353 = vmatprep.subr.mxu1 %v443_v0  ;;  %384 = vmatprep.subr.mxu0 %v443_v0  ;;  %v34_v36 = vrot.slane %v28_v35, %v33_v34  ;;  %v203_v43 = vld [vmem:[#allocation2 + $0x100] sm:$0xff]  ;;  %v130_v45 = vrot.slane %v28_v35, %v129_v44  ;;  %v222_v51 = vrot.slane %v28_v35, %v221_v50 }
  0x1a   :  { %354 = vmatpush3.msra.mxu1 %v121_v8  ;;  %385 = vmatpush3.msra.mxu0 %v215_v22 }
  0x1b   :  { %355 = vmatprep.subr.mxu1 %v443_v0  ;;  %386 = vmatprep.subr.mxu0 %v443_v0 }
  0x1c   :  { %356 = vmatpush3.msra.mxu1 %v120_v9  ;;  %387 = vmatpush3.msra.mxu0 %v214_v23 }
  0x1d   :  { %357 = vmatprep.subr.mxu1 %v443_v0  ;;  %388 = vmatprep.subr.mxu0 %v443_v0 }
  0x1e   :  { %358 = vmatpush3.msra.mxu1 %v119_v10  ;;  %389 = vmatpush3.msra.mxu0 %v213_v24 }
  0x1f   :  { %359 = vmatprep.subr.mxu1 %v443_v0  ;;  %390 = vmatprep.subr.mxu0 %v443_v0 }
  0x20   :  { %360 = vmatpush3.msra.mxu1 %v118_v11  ;;  %391 = vmatpush3.msra.mxu0 %v212_v25 }
  0x21   :  { %361 = vmatprep.subr.mxu1 %v443_v0  ;;  %392 = vmatprep.subr.mxu0 %v443_v0 }
  0x22   :  { %362 = vmatpush3.msra.mxu1 %v117_v12  ;;  %393 = vmatpush3.msra.mxu0 %v211_v26 }
  0x23   :  { %363 = vmatprep.subr.mxu1 %v443_v0  ;;  %394 = vmatprep.subr.mxu0 %v443_v0 }
  0x24   :  { %364 = vmatpush3.msra.mxu1 %v116_v13  ;;  %395 = vmatpush3.msra.mxu0 %v210_v27 }
  0x25   :  { %365 = vmatprep.subr.mxu1 %v443_v0  ;;  %396 = vmatprep.subr.mxu0 %v443_v0 }
  0x26   :  { %366 = vmatpush3.msra.mxu1 %v115_v14  ;;  %397 = vmatpush3.msra.mxu0 %v209_v28 }
  0x27   :  { %367 = vmatprep.subr.mxu1 %v443_v0  ;;  %398 = vmatprep.subr.mxu0 %v443_v0 }
  0x28   :  { %368 = vmatpush3.msra.mxu1 %v114_v15  ;;  %399 = vmatpush3.msra.mxu0 %v208_v29 }
  0x29   :  { %369 = vmatprep.subr.mxu1 %v443_v0  ;;  %400 = vmatprep.subr.mxu0 %v443_v0 }
  0x2a   :  { %370 = vmatpush3.msra.mxu1 %v113_v16  ;;  %401 = vmatpush3.msra.mxu0 %v207_v30 }
  0x2b   :  { %371 = vmatprep.subr.mxu1 %v443_v0  ;;  %402 = vmatprep.subr.mxu0 %v443_v0 }
  0x2c   :  { %372 = vmatpush3.msra.mxu1 %v112_v17  ;;  %403 = vmatpush3.msra.mxu0 %v206_v31 }
  0x2d   :  { %373 = vmatprep.subr.mxu1 %v443_v0  ;;  %404 = vmatprep.subr.mxu0 %v443_v0 }
  0x2e   :  { %374 = vmatpush3.msra.mxu1 %v111_v18  ;;  %405 = vmatpush3.msra.mxu0 %v205_v41 }
  0x2f   :  { %406 = vmatprep.subr.mxu0 %v443_v0 }
  0x30   :  { %407 = vmatpush3.msra.mxu0 %v204_v42 }
  0x31   :  { %408 = vmatprep.subr.mxu0 %v443_v0 }
  0x32   :  { %409 = vmatpush3.msra.mxu0 %v203_v43 }
  0xd1   :  { %v105_v37 = vpop.f32.mrf.mxu0 }
  0xd2   :  { %v106_v38 = vadd.f32 %v105_v37, %v34_v36 }
  0xd3   :  { %v342_v39 = vpop.f32.mrf.mxu0 }
  0xd4   :  { %v109_v40 = vmax.f32 %v106_v38, 0.0 }
  0xd6   :  { %376 = vmatmul.mubr.f32.vlgmr.msra.gmra.mxu1 %v109_v40 }
 0x196   :  { %v197_v46 = vpop.f32.mrf.mxu1 }
 0x197   :  { %v198_v47 = vadd.f32 %v197_v46, %v130_v45 }
 0x198   :  { %v377_v48 = vpop.f32.mrf.mxu1 }
 0x199   :  { %v201_v49 = vmax.f32 %v198_v47, 0.0 }
 0x19b   :  { %411 = vmatmul.mubr.f32.vlgmr.msra.gmra.mxu0 %v201_v49 }
 0x25b   :  { %v289_v52 = vpop.f32.mrf.mxu0 }
 0x25c   :  { %v290_v53 = vadd.f32 %v289_v52, %v222_v51 }
 0x25d   :  { %v412_v54 = vpop.f32.mrf.mxu0 }
 0x25e   :  { %v293_v55 = vmax.f32 %v290_v53, 0.0 }
 0x260   :  { %295 = vst.msk [vmem:[%s519_s3] sm:$0xff] %vm294_vm2, %v293_v55 }
 0x261   :  { %300 = vsyncpa [#allocation3], 1 }

</bundles_post_ra>
